<compile_context>
chip_gen: v5e
topology: v5e:2x2
jax: 0.10.0
libtpu: 0.0.40
codegen_flags: <defaults>
</compile_context>

<pallas_src>
import functools

import jax
import jax.numpy as jnp
from jax.experimental import pallas as pl
from jax.experimental.pallas import tpu as pltpu


def _round_up(a, b):
    return ((a + b - 1) // b) * b


# ------------------------------ Pallas kernel -------------------------------

def _bottleneck_kernel(x_ref, w1_ref, b1_ref, w2_ref, b2_ref, o_ref,
                       ypad_ref, stack_ref, *, h, w, n_valid):
    """conv1(1x1)+BN1+ReLU -> conv2(3x3,pad=1)+BN2 -> +identity -> ReLU.

    x_ref    : (Cin,  Npad)          one batch element, Npad = pad128(H*W)
    w1_ref   : (Cout, Cin)           compute dtype, BN1 scale folded in
    b1_ref   : (Cout, 1)     f32     folded BN1 bias
    w2_ref   : (Cout, 9*Cout)        compute dtype, BN2 scale folded in,
                                     column index = tap*Cout + c, tap = ky*3+kx
    b2_ref   : (Cout, 1)     f32     folded BN2 bias
    o_ref    : (Cout, Npad)
    ypad_ref : (Cout, Npad + 2*pad)  scratch: zero-padded flat conv1 activation
    stack_ref: (9*Cout, Npad)        scratch: shifted activations stacked on
                                     the contraction axis
    """
    cdt = w1_ref.dtype
    cout = w1_ref.shape[0]
    n_pad = o_ref.shape[-1]
    pad = (ypad_ref.shape[-1] - n_pad) // 2          # lane-aligned (128-mult)

    # --- conv1 (1x1, no bias) + folded BN1 + ReLU; f32 accumulate/epilogue ---
    y = jnp.dot(w1_ref[...], x_ref[...].astype(cdt),
                preferred_element_type=jnp.float32)
    y = jnp.maximum(y + b1_ref[...], 0.0)            # (Cout, Npad) f32

    pos = jax.lax.broadcasted_iota(jnp.int32, (1, n_pad), 1)
    if n_valid < n_pad:
        # Zero the lane-padding tail so it cannot leak into dy=+1 taps of the
        # last spatial row.  (Static no-op when H*W is already lane dense.)
        y = y * jnp.where(pos < n_valid, 1.0, 0.0)

    # --- zero-padded flat buffer: shifted reads replace the shift matmuls ----
    ypad_ref[...] = jnp.zeros_like(ypad_ref)
    ypad_ref[:, pad:pad + n_pad] = y.astype(cdt)     # lane-aligned store

    # Column-validity masks (output-position columns) for dx = -1 / +1; the
    # zero border of ypad handles all out-of-image row shifts automatically.
    col = pos % w
    one = jnp.ones((1, n_pad), cdt)
    zero = jnp.zeros((1, n_pad), cdt)
    mask_l = jnp.where(col > 0, one, zero)           # dx = -1 valid
    mask_r = jnp.where(col < w - 1, one, zero)       # dx = +1 valid

    # --- materialize the 9 shifted activations on the contraction axis ------
    for ky in range(3):
        for kx in range(3):
            t = ky * 3 + kx
            s = (ky - 1) * w + (kx - 1)              # flat source offset
            ys = ypad_ref[:, pad + s:pad + s + n_pad]
            if kx == 0:
                ys = ys * mask_l
            elif kx == 2:
                ys = ys * mask_r
            stack_ref[t * cout:(t + 1) * cout, :] = ys

    # --- conv2 (3x3) as ONE deep-contraction matmul + BN2 + residual + ReLU --
    out = jnp.dot(w2_ref[...], stack_ref[...],
                  preferred_element_type=jnp.float32)
    out = out + b2_ref[...] + x_ref[...].astype(jnp.float32)   # identity add
    o_ref[...] = jnp.maximum(out, 0.0).astype(o_ref.dtype)


# ------------------------------ forward glue --------------------------------

def custom_bottleneck_forward(x_nchw, params):
    """use_attention=False CustomBottleneck forward, NCHW in / NCHW out."""
    b, cin, h, w = x_nchw.shape
    cout, cin_w = params["w1"].shape
    assert cin == cin_w
    assert cin == cout, "residual add requires in_channels == out_channels"
    assert params["w2"].shape == (cout, 9 * cout)

    n = h * w
    n_pad = _round_up(n, 128)                 # lane-dense spatial axis
    pad = _round_up(w + 1, 128)               # lane-aligned halo for ypad
    cdt = params["w1"].dtype

    x2 = x_nchw.reshape(b, cin, n)            # NCHW consumed directly
    if n_pad != n:
        x2 = jnp.pad(x2, ((0, 0), (0, 0), (0, n_pad - n)))

    kernel = functools.partial(_bottleneck_kernel, h=h, w=w, n_valid=n)

    out = pl.pallas_call(
        kernel,
        out_shape=jax.ShapeDtypeStruct((b, cout, n_pad), x_nchw.dtype),
        grid_spec=pltpu.PrefetchScalarGridSpec(
            num_scalar_prefetch=0,
            grid=(b,),
            in_specs=[
                pl.BlockSpec((None, cin, n_pad), lambda i: (i, 0, 0)),
                # Constant-index operands: the pipeline only fetches them once.
                pl.BlockSpec((cout, cin), lambda i: (0, 0)),
                pl.BlockSpec((cout, 1), lambda i: (0, 0)),
                pl.BlockSpec((cout, 9 * cout), lambda i: (0, 0)),
                pl.BlockSpec((cout, 1), lambda i: (0, 0)),
            ],
            out_specs=pl.BlockSpec((None, cout, n_pad), lambda i: (i, 0, 0)),
            scratch_shapes=[
                pltpu.VMEM((cout, n_pad + 2 * pad), cdt),   # padded conv1 act
                pltpu.VMEM((9 * cout, n_pad), cdt),         # stacked taps
            ],
        ),
        compiler_params=pltpu.CompilerParams(
            dimension_semantics=("parallel",)),   # batch across megacore
    )(x2, params["w1"], params["b1"], params["w2"], params["b2"])

    return out[:, :, :n].reshape(b, cout, h, w)


# ------------------------------ param folding -------------------------------

def prepare_params(w1_t, w2_t, bn1, bn2, *, compute_dtype=jnp.float32,
                   eps=1e-5):
    """Fold eval-mode BN into the conv weights / biases and fuse conv2's nine
    3x3 taps into one (Cout, 9*Cin) matrix whose column t*Cin + c matches the
    in-kernel shifted-activation stack (t = ky*3 + kx)."""
    g1, be1, m1, v1 = bn1
    g2, be2, m2, v2 = bn2
    s1 = g1 / jnp.sqrt(v1 + eps)
    s2 = g2 / jnp.sqrt(v2 + eps)
    cout, _ = w1_t.shape
    c2o, c2i, kh, kw = w2_t.shape
    w2f = jnp.transpose(w2_t, (0, 2, 3, 1)).reshape(c2o, kh * kw * c2i)
    return {
        "w1": (w1_t * s1[:, None]).astype(compute_dtype),
        "b1": (be1 - m1 * s1).reshape(cout, 1).astype(jnp.float32),
        "w2": (w2f * s2[:, None]).astype(compute_dtype),
        "b2": (be2 - m2 * s2).reshape(c2o, 1).astype(jnp.float32),
    }


# ------------------------------- pure-JAX ref --------------------------------

def reference_forward(x, w1_t, w2_t, bn1, bn2, eps=1e-5):
    def bn(t, p):
        g, be, m, v = p
        inv = g / jnp.sqrt(v + eps)
        return (t - m[None, :, None, None]) * inv[None, :, None, None] \
            + be[None, :, None, None]

    y = jnp.einsum('oc,bchw->bohw', w1_t, x)
    y = jnp.maximum(bn(y, bn1), 0.0)
    y2 = jax.lax.conv_general_dilated(
        y, w2_t, window_strides=(1, 1), padding='SAME',
        dimension_numbers=('NCHW', 'OIHW', 'NCHW'))
    y2 = bn(y2, bn2)
    return jnp.maximum(y2 + x, 0.0)


# ----------------------------------- main ------------------------------------

def _make_case(key, b, c, h, w):
    ks = jax.random.split(key, 11)
    x = jax.random.normal(ks[0], (b, c, h, w), dtype=jnp.float32)
    w1_t = 0.1 * jax.random.normal(ks[1], (c, c), dtype=jnp.float32)
    w2_t = 0.1 * jax.random.normal(ks[2], (c, c, 3, 3), dtype=jnp.float32)
    bn1 = (1.0 + 0.1 * jax.random.normal(ks[3], (c,)),
           0.1 * jax.random.normal(ks[4], (c,)),
           0.1 * jax.random.normal(ks[5], (c,)),
           jax.random.uniform(ks[6], (c,), minval=0.5, maxval=1.5))
    bn2 = (1.0 + 0.1 * jax.random.normal(ks[7], (c,)),
           0.1 * jax.random.normal(ks[8], (c,)),
           0.1 * jax.random.normal(ks[9], (c,)),
           jax.random.uniform(ks[10], (c,), minval=0.5, maxval=1.5))
    return x, w1_t, w2_t, bn1, bn2


if __name__ == "__main__":
    fwd = jax.jit(custom_bottleneck_forward)

    # Case 1: 16x16 fmap (H*W = 256, already lane dense), f32 operands.
    x, w1_t, w2_t, bn1, bn2 = _make_case(jax.random.PRNGKey(0), 2, 8, 16, 16)
    ref = reference_forward(x, w1_t, w2_t, bn1, bn2)
    p32 = prepare_params(w1_t, w2_t, bn1, bn2, compute_dtype=jnp.float32)
    out32 = jax.block_until_ready(fwd(x, p32))
    assert out32.shape == x.shape, out32.shape
    err32 = float(jnp.max(jnp.abs(out32 - ref)))
    assert err32 < 1e-4, f"f32 kernel mismatch vs reference: {err32}"

    # Case 1b: bf16 HBM I/O + bf16 matmul operands, f32 accumulate + epilogue.
    pbf = prepare_params(w1_t, w2_t, bn1, bn2, compute_dtype=jnp.bfloat16)
    outbf = jax.block_until_ready(fwd(x.astype(jnp.bfloat16), pbf))
    errbf = float(jnp.max(jnp.abs(outbf.astype(jnp.float32) - ref)))
    assert errbf < 2e-1, f"bf16 kernel mismatch vs reference: {errbf}"

    # Case 2: 14x14 fmap (BoTNet-c5-like, H*W = 196 not a lane multiple) —
    # exercises the lane-padding / stripping path.
    xb, w1b, w2b, bn1b, bn2b = _make_case(jax.random.PRNGKey(1), 2, 8, 14, 14)
    refb = reference_forward(xb, w1b, w2b, bn1b, bn2b)
    pb = prepare_params(w1b, w2b, bn1b, bn2b, compute_dtype=jnp.float32)
    outb = jax.block_until_ready(fwd(xb, pb))
    errb = float(jnp.max(jnp.abs(outb - refb)))
    assert errb < 1e-4, f"f32 kernel mismatch (14x14): {errb}"

    print("KERNEL_OK")
</pallas_src>

<mosaic_0001>
module attributes {stable_mosaic.version = 11 : i64} {
  func.func @_bottleneck_kernel(%arg0: i32, %arg1: memref<1x8x256xf32, #tpu.memory_space<vmem>>, %arg2: memref<8x8xf32, #tpu.memory_space<vmem>>, %arg3: memref<8x1xf32, #tpu.memory_space<vmem>>, %arg4: memref<8x72xf32, #tpu.memory_space<vmem>>, %arg5: memref<8x1xf32, #tpu.memory_space<vmem>>, %arg6: memref<1x8x256xf32, #tpu.memory_space<vmem>>, %arg7: memref<8x512xf32, #tpu.memory_space<vmem>>, %arg8: memref<72x256xf32, #tpu.memory_space<vmem>>) attributes {dimension_semantics = [#tpu.dimension_semantics<parallel>], iteration_bounds = array<i64: 2>, scalar_prefetch = 0 : i64, scratch_operands = 2 : i64, tpu.core_type = #tpu.core_type<tc>, window_params = [{transform_indices = @transform_0, window_bounds = array<i64: 1, 8, 256>}, {pipeline_mode = #tpu.pipeline_mode<synchronous>, transform_indices = @transform_1, window_bounds = array<i64: 8, 8>}, {pipeline_mode = #tpu.pipeline_mode<synchronous>, transform_indices = @transform_2, window_bounds = array<i64: 8, 1>}, {pipeline_mode = #tpu.pipeline_mode<synchronous>, transform_indices = @transform_3, window_bounds = array<i64: 8, 72>}, {pipeline_mode = #tpu.pipeline_mode<synchronous>, transform_indices = @transform_4, window_bounds = array<i64: 8, 1>}, {transform_indices = @transform_5, window_bounds = array<i64: 1, 8, 256>}]} {
    %c0 = arith.constant 0 : index
    %c0_0 = arith.constant 0 : index
    %0 = vector.load %arg2[%c0, %c0_0] : memref<8x8xf32, #tpu.memory_space<vmem>>, vector<8x8xf32>
    %c0_1 = arith.constant 0 : index
    %c0_2 = arith.constant 0 : index
    %c0_3 = arith.constant 0 : index
    %1 = vector.load %arg1[%c0_1, %c0_2, %c0_3] : memref<1x8x256xf32, #tpu.memory_space<vmem>>, vector<1x8x256xf32>
    %2 = vector.shape_cast %1 : vector<1x8x256xf32> to vector<8x256xf32>
    %cst = arith.constant dense<0.000000e+00> : vector<8x256xf32>
    %3 = tpu.matmul %0, %2, %cst {dimension_numbers = #tpu.dot_dimension_numbers<[1], [0], [0], [1], [0, 0, 1, 1], [], []>} : vector<8x8xf32>, vector<8x256xf32>, vector<8x256xf32> -> vector<8x256xf32>
    %c0_4 = arith.constant 0 : index
    %c0_5 = arith.constant 0 : index
    %4 = vector.load %arg3[%c0_4, %c0_5] : memref<8x1xf32, #tpu.memory_space<vmem>>, vector<8x1xf32>
    %5 = vector.broadcast %4 : vector<8x1xf32> to vector<8x256xf32>
    %6 = arith.addf %3, %5 : vector<8x256xf32>
    %cst_6 = arith.constant 0.000000e+00 : f32
    %7 = vector.broadcast %cst_6 : f32 to vector<8x256xf32>
    %8 = arith.maximumf %6, %7 : vector<8x256xf32>
    %9 = tpu.iota {dimensions = array<i32: 1>} : vector<1x256xi32>
    %cst_7 = arith.constant 0.000000e+00 : f32
    %10 = vector.broadcast %cst_7 : f32 to vector<8x512xf32>
    %c0_8 = arith.constant 0 : index
    %c0_9 = arith.constant 0 : index
    %11 = vector.load %arg7[%c0_8, %c0_9] : memref<8x512xf32, #tpu.memory_space<vmem>>, vector<8x512xf32>
    tpu.vector_store %arg7[%c0_8, %c0_9], %10 {strides = array<i32>} : memref<8x512xf32, #tpu.memory_space<vmem>>, vector<8x512xf32>,
    %c0_10 = arith.constant 0 : index
    %c128 = arith.constant 128 : index
    %12 = vector.load %arg7[%c0_10, %c128] : memref<8x512xf32, #tpu.memory_space<vmem>>, vector<8x256xf32>
    tpu.vector_store %arg7[%c0_10, %c128], %8 {strides = array<i32>} : memref<8x512xf32, #tpu.memory_space<vmem>>, vector<8x256xf32>,
    %c16_i32 = arith.constant 16 : i32
    %c0_i32 = arith.constant 0 : i32
    %13 = arith.cmpi eq, %c16_i32, %c0_i32 : i32
    %c1_i32 = arith.constant 1 : i32
    %14 = arith.select %13, %c1_i32, %c16_i32 : i32
    %15 = vector.broadcast %14 : i32 to vector<1x256xi32>
    %16 = arith.remsi %9, %15 : vector<1x256xi32>
    %c0_i32_11 = arith.constant 0 : i32
    %17 = vector.broadcast %c0_i32_11 : i32 to vector<1x256xi32>
    %18 = arith.cmpi ne, %16, %17 : vector<1x256xi32>
    %c0_i32_12 = arith.constant 0 : i32
    %19 = vector.broadcast %c0_i32_12 : i32 to vector<1x256xi32>
    %20 = arith.cmpi slt, %16, %19 : vector<1x256xi32>
    %c0_i32_13 = arith.constant 0 : i32
    %21 = arith.cmpi slt, %14, %c0_i32_13 : i32
    %22 = vector.broadcast %21 : i1 to vector<1x256xi1>
    %23 = vector.broadcast %22 : vector<1x256xi1> to vector<1x256xi1>
    %24 = arith.xori %20, %23 : vector<1x256xi1>
    %25 = arith.andi %24, %18 : vector<1x256xi1>
    %26 = vector.broadcast %14 : i32 to vector<1x256xi32>
    %27 = arith.addi %16, %26 : vector<1x256xi32>
    %28 = arith.select %25, %27, %16 : vector<1x256xi1>, vector<1x256xi32>
    %cst_14 = arith.constant 1.000000e+00 : f32
    %29 = vector.broadcast %cst_14 : f32 to vector<1x256xf32>
    %cst_15 = arith.constant 0.000000e+00 : f32
    %30 = vector.broadcast %cst_15 : f32 to vector<1x256xf32>
    %c0_i32_16 = arith.constant 0 : i32
    %31 = vector.broadcast %c0_i32_16 : i32 to vector<1x256xi32>
    %32 = arith.cmpi sgt, %28, %31 : vector<1x256xi32>
    %33 = arith.select %32, %29, %30 : vector<1x256xi1>, vector<1x256xf32>
    %c15_i32 = arith.constant 15 : i32
    %34 = vector.broadcast %c15_i32 : i32 to vector<1x256xi32>
    %35 = arith.cmpi slt, %28, %34 : vector<1x256xi32>
    %36 = arith.select %35, %29, %30 : vector<1x256xi1>, vector<1x256xf32>
    %c0_17 = arith.constant 0 : index
    %c111 = arith.constant 111 : index
    %37 = vector.load %arg7[%c0_17, %c111] : memref<8x512xf32, #tpu.memory_space<vmem>>, vector<8x256xf32>
    %38 = vector.broadcast %33 : vector<1x256xf32> to vector<8x256xf32>
    %39 = arith.mulf %37, %38 : vector<8x256xf32>
    %c0_18 = arith.constant 0 : index
    %c0_19 = arith.constant 0 : index
    %40 = vector.load %arg8[%c0_18, %c0_19] : memref<72x256xf32, #tpu.memory_space<vmem>>, vector<8x256xf32>
    tpu.vector_store %arg8[%c0_18, %c0_19], %39 {strides = array<i32>} : memref<72x256xf32, #tpu.memory_space<vmem>>, vector<8x256xf32>,
    %c0_20 = arith.constant 0 : index
    %c112 = arith.constant 112 : index
    %41 = vector.load %arg7[%c0_20, %c112] : memref<8x512xf32, #tpu.memory_space<vmem>>, vector<8x256xf32>
    %c8 = arith.constant 8 : index
    %c0_21 = arith.constant 0 : index
    %42 = vector.load %arg8[%c8, %c0_21] : memref<72x256xf32, #tpu.memory_space<vmem>>, vector<8x256xf32>
    tpu.vector_store %arg8[%c8, %c0_21], %41 {strides = array<i32>} : memref<72x256xf32, #tpu.memory_space<vmem>>, vector<8x256xf32>,
    %c0_22 = arith.constant 0 : index
    %c113 = arith.constant 113 : index
    %43 = vector.load %arg7[%c0_22, %c113] : memref<8x512xf32, #tpu.memory_space<vmem>>, vector<8x256xf32>
    %44 = vector.broadcast %36 : vector<1x256xf32> to vector<8x256xf32>
    %45 = arith.mulf %43, %44 : vector<8x256xf32>
    %c16 = arith.constant 16 : index
    %c0_23 = arith.constant 0 : index
    %46 = vector.load %arg8[%c16, %c0_23] : memref<72x256xf32, #tpu.memory_space<vmem>>, vector<8x256xf32>
    tpu.vector_store %arg8[%c16, %c0_23], %45 {strides = array<i32>} : memref<72x256xf32, #tpu.memory_space<vmem>>, vector<8x256xf32>,
    %c0_24 = arith.constant 0 : index
    %c127 = arith.constant 127 : index
    %47 = vector.load %arg7[%c0_24, %c127] : memref<8x512xf32, #tpu.memory_space<vmem>>, vector<8x256xf32>
    %48 = vector.broadcast %33 : vector<1x256xf32> to vector<8x256xf32>
    %49 = arith.mulf %47, %48 : vector<8x256xf32>
    %c24 = arith.constant 24 : index
    %c0_25 = arith.constant 0 : index
    %50 = vector.load %arg8[%c24, %c0_25] : memref<72x256xf32, #tpu.memory_space<vmem>>, vector<8x256xf32>
    tpu.vector_store %arg8[%c24, %c0_25], %49 {strides = array<i32>} : memref<72x256xf32, #tpu.memory_space<vmem>>, vector<8x256xf32>,
    %c0_26 = arith.constant 0 : index
    %c128_27 = arith.constant 128 : index
    %51 = vector.load %arg7[%c0_26, %c128_27] : memref<8x512xf32, #tpu.memory_space<vmem>>, vector<8x256xf32>
    %c32 = arith.constant 32 : index
    %c0_28 = arith.constant 0 : index
    %52 = vector.load %arg8[%c32, %c0_28] : memref<72x256xf32, #tpu.memory_space<vmem>>, vector<8x256xf32>
    tpu.vector_store %arg8[%c32, %c0_28], %51 {strides = array<i32>} : memref<72x256xf32, #tpu.memory_space<vmem>>, vector<8x256xf32>,
    %c0_29 = arith.constant 0 : index
    %c129 = arith.constant 129 : index
    %53 = vector.load %arg7[%c0_29, %c129] : memref<8x512xf32, #tpu.memory_space<vmem>>, vector<8x256xf32>
    %54 = vector.broadcast %36 : vector<1x256xf32> to vector<8x256xf32>
    %55 = arith.mulf %53, %54 : vector<8x256xf32>
    %c40 = arith.constant 40 : index
    %c0_30 = arith.constant 0 : index
    %56 = vector.load %arg8[%c40, %c0_30] : memref<72x256xf32, #tpu.memory_space<vmem>>, vector<8x256xf32>
    tpu.vector_store %arg8[%c40, %c0_30], %55 {strides = array<i32>} : memref<72x256xf32, #tpu.memory_space<vmem>>, vector<8x256xf32>,
    %c0_31 = arith.constant 0 : index
    %c143 = arith.constant 143 : index
    %57 = vector.load %arg7[%c0_31, %c143] : memref<8x512xf32, #tpu.memory_space<vmem>>, vector<8x256xf32>
    %58 = vector.broadcast %33 : vector<1x256xf32> to vector<8x256xf32>
    %59 = arith.mulf %57, %58 : vector<8x256xf32>
    %c48 = arith.constant 48 : index
    %c0_32 = arith.constant 0 : index
    %60 = vector.load %arg8[%c48, %c0_32] : memref<72x256xf32, #tpu.memory_space<vmem>>, vector<8x256xf32>
    tpu.vector_store %arg8[%c48, %c0_32], %59 {strides = array<i32>} : memref<72x256xf32, #tpu.memory_space<vmem>>, vector<8x256xf32>,
    %c0_33 = arith.constant 0 : index
    %c144 = arith.constant 144 : index
    %61 = vector.load %arg7[%c0_33, %c144] : memref<8x512xf32, #tpu.memory_space<vmem>>, vector<8x256xf32>
    %c56 = arith.constant 56 : index
    %c0_34 = arith.constant 0 : index
    %62 = vector.load %arg8[%c56, %c0_34] : memref<72x256xf32, #tpu.memory_space<vmem>>, vector<8x256xf32>
    tpu.vector_store %arg8[%c56, %c0_34], %61 {strides = array<i32>} : memref<72x256xf32, #tpu.memory_space<vmem>>, vector<8x256xf32>,
    %c0_35 = arith.constant 0 : index
    %c145 = arith.constant 145 : index
    %63 = vector.load %arg7[%c0_35, %c145] : memref<8x512xf32, #tpu.memory_space<vmem>>, vector<8x256xf32>
    %64 = vector.broadcast %36 : vector<1x256xf32> to vector<8x256xf32>
    %65 = arith.mulf %63, %64 : vector<8x256xf32>
    %c64 = arith.constant 64 : index
    %c0_36 = arith.constant 0 : index
    %66 = vector.load %arg8[%c64, %c0_36] : memref<72x256xf32, #tpu.memory_space<vmem>>, vector<8x256xf32>
    tpu.vector_store %arg8[%c64, %c0_36], %65 {strides = array<i32>} : memref<72x256xf32, #tpu.memory_space<vmem>>, vector<8x256xf32>,
    %c0_37 = arith.constant 0 : index
    %c0_38 = arith.constant 0 : index
    %67 = vector.load %arg4[%c0_37, %c0_38] : memref<8x72xf32, #tpu.memory_space<vmem>>, vector<8x72xf32>
    %c0_39 = arith.constant 0 : index
    %c0_40 = arith.constant 0 : index
    %68 = vector.load %arg8[%c0_39, %c0_40] : memref<72x256xf32, #tpu.memory_space<vmem>>, vector<72x256xf32>
    %cst_41 = arith.constant dense<0.000000e+00> : vector<8x256xf32>
    %69 = tpu.matmul %67, %68, %cst_41 {dimension_numbers = #tpu.dot_dimension_numbers<[1], [0], [0], [1], [0, 0, 1, 1], [], []>} : vector<8x72xf32>, vector<72x256xf32>, vector<8x256xf32> -> vector<8x256xf32>
    %c0_42 = arith.constant 0 : index
    %c0_43 = arith.constant 0 : index
    %70 = vector.load %arg5[%c0_42, %c0_43] : memref<8x1xf32, #tpu.memory_space<vmem>>, vector<8x1xf32>
    %71 = vector.broadcast %70 : vector<8x1xf32> to vector<8x256xf32>
    %72 = arith.addf %69, %71 : vector<8x256xf32>
    %c0_44 = arith.constant 0 : index
    %c0_45 = arith.constant 0 : index
    %c0_46 = arith.constant 0 : index
    %73 = vector.load %arg1[%c0_44, %c0_45, %c0_46] : memref<1x8x256xf32, #tpu.memory_space<vmem>>, vector<1x8x256xf32>
    %74 = vector.shape_cast %73 : vector<1x8x256xf32> to vector<8x256xf32>
    %75 = arith.addf %72, %74 : vector<8x256xf32>
    %cst_47 = arith.constant 0.000000e+00 : f32
    %76 = vector.broadcast %cst_47 : f32 to vector<8x256xf32>
    %77 = arith.maximumf %75, %76 : vector<8x256xf32>
    %c0_48 = arith.constant 0 : index
    %c0_49 = arith.constant 0 : index
    %c0_50 = arith.constant 0 : index
    %78 = vector.load %arg6[%c0_48, %c0_49, %c0_50] : memref<1x8x256xf32, #tpu.memory_space<vmem>>, vector<1x8x256xf32>
    %79 = vector.shape_cast %78 : vector<1x8x256xf32> to vector<8x256xf32>
    %80 = vector.shape_cast %77 : vector<8x256xf32> to vector<1x8x256xf32>
    tpu.vector_store %arg6[%c0_48, %c0_49, %c0_50], %80 {strides = array<i32>} : memref<1x8x256xf32, #tpu.memory_space<vmem>>, vector<1x8x256xf32>,
    return
  }
  func.func @transform_0(%arg0: i32) -> (i32, i32, i32) {
    %c0_i32 = arith.constant 0 : i32
    %c0_i32_0 = arith.constant 0 : i32
    %c0_i32_1 = arith.constant 0 : i32
    return %arg0, %c0_i32, %c0_i32_0 : i32, i32, i32
  }
  func.func @transform_1(%arg0: i32) -> (i32, i32) {
    %c0_i32 = arith.constant 0 : i32
    %c0_i32_0 = arith.constant 0 : i32
    %c0_i32_1 = arith.constant 0 : i32
    return %c0_i32, %c0_i32_0 : i32, i32
  }
  func.func @transform_2(%arg0: i32) -> (i32, i32) {
    %c0_i32 = arith.constant 0 : i32
    %c0_i32_0 = arith.constant 0 : i32
    %c0_i32_1 = arith.constant 0 : i32
    return %c0_i32, %c0_i32_0 : i32, i32
  }
  func.func @transform_3(%arg0: i32) -> (i32, i32) {
    %c0_i32 = arith.constant 0 : i32
    %c0_i32_0 = arith.constant 0 : i32
    %c0_i32_1 = arith.constant 0 : i32
    return %c0_i32, %c0_i32_0 : i32, i32
  }
  func.func @transform_4(%arg0: i32) -> (i32, i32) {
    %c0_i32 = arith.constant 0 : i32
    %c0_i32_0 = arith.constant 0 : i32
    %c0_i32_1 = arith.constant 0 : i32
    return %c0_i32, %c0_i32_0 : i32, i32
  }
  func.func @transform_5(%arg0: i32) -> (i32, i32, i32) {
    %c0_i32 = arith.constant 0 : i32
    %c0_i32_0 = arith.constant 0 : i32
    %c0_i32_1 = arith.constant 0 : i32
    return %arg0, %c0_i32, %c0_i32_0 : i32, i32, i32
  }
}

</mosaic_0001>

<bundles_post_ra>
// kernel: custom_bottleneck_forward.1
= control target key start
LH: loop header
LB: loop body
LE: loop exit
PB: predicated region body
PF: predicated region fallthrough
CT: control target
= control target key end

     0   :  { %s834_s18 = smov 0   ;;  %s950_s0 = inlined_call_operand.vmem [shape: f32[2,8,256], index: 0, kind: input, shape index: {}]   ;;  %s951_s1 = inlined_call_operand.vmem [shape: f32[8,8], index: 1, kind: input, shape index: {}]   ;;  %s952_s2 = inlined_call_operand.vmem [shape: f32[8,1], index: 2, kind: input, shape index: {}]   ;;  %s953_s3 = inlined_call_operand.vmem [shape: f32[8,72], index: 3, kind: input, shape index: {}]   ;;  %s954_s4 = inlined_call_operand.vmem [shape: f32[8,1], index: 4, kind: input, shape index: {}]   ;;  %s955_s5 = inlined_call_operand.vmem [shape: f32[2,8,256], index: 5, kind: output, shape index: {}]  }
   0x1 LB: > { %s679_s19 = sadd.s32 4294967295, %s792_s18   ;;  %p683_p0 = scmp.ge.s32.totalorder %s792_s18, 1  ;;  %s792_s18 = sphi %s834_s18, %s15_s18  }
   0x2   : > { %p187_p1 = scmp.lt.s32.totalorder %s792_s18, 3 }
   0x4   : > { %p188_p2 = pnand %p683_p0, %p187_p1 }
   0x5   : > { %p215_p3 = scmp.lt.s32.totalorder (!%p188_p2), %s679_s19, 1  ;;  %s796_s28 = smov (!%p188_p2), 15  }
   0x6   : > { %191 = sbr.rel (%p188_p2) target bundleno = 436 (0x1b4), region = 40  ;;  %s797_s29 = smov (!%p188_p2), 17  }
   0x7   : > { %s798_s30 = smov (!%p188_p2), 127   ;;  %s799_s6 = smov (!%p188_p2), 1  }
   0x8   : > { %s800_s7 = smov (!%p188_p2), 111   ;;  %s801_s8 = smov (!%p188_p2), 113  }
   0x9   : > { %s802_s9 = smov (!%p188_p2), 112   ;;  %s803_s10 = smov (!%p188_p2), 16  }
   0xb   : > { %v228_v0 = vld [vmem:[%s952_s2] sm:$0xff]  ;;  %v280_v1 = vlaneseq  ;;  %v794_v2 = vmov 0   ;;  %s957_s19 = smov (!%p215_p3, %s679_s19), 1  ;;  %vm234_vm0 = vcmask 64512   ;;  %v795_v10 = vmov 0.0  }
   0xc   : > { %714 = vset.pattern.permute.xlu0 %v794_v2  ;;  %785 = vset.pattern.permute.xlu2 %v794_v2  ;;  %s694_s22 = sshll.u32 %s957_s19, 4  ;;  %v225_v6 = vld [vmem:[%s951_s1] sm:$0xff]  ;;  %vm399_vm5 = vcmask 121856   ;;  %vm347_vm6 = vcmask 138240   ;;  %vm413_vm7 = vcmask 1039360   ;;  %vm382_vm8 = vcmask 924672  }
   0xd   : > { %231 = vperm.xlu0 %714, %v228_v0   ;;  %v281_v3 = vand.u32 127, %v280_v1  ;;  %s219_s25 = scalar_lea.vmem %s950_s0, %s694_s22  ;;  %vm430_vm9 = vcmask 7168   ;;  %vm330_vm10 = vcmask 908288   ;;  %vm511_vm11 = vcmask 916480   ;;  %s224_s17 = scalar_lea.vmem %s955_s5, %s694_s22 }
   0xe   : > { %v856_v7 = vld [vmem:[%s219_s25] sm:$0xff]  ;;  %v858_v8 = vld [vmem:[%s219_s25 + $0x8] sm:$0xff]  ;;  %vm366_vm12 = vcmask 130048   ;;  %vm572_vm13 = vcmask 588800  }
   0xf   : > { %v282_v4 = vadd.s32 128, %v281_v3  ;;  %v293_v5 = vand.u32 15, %v281_v3  ;;  %253 = vmatpush.msra.mxu0 %v856_v7  ;;  %273 = vmatpush.msra.mxu1 %v858_v8 }
  0x10   : > { %688 = vmatmul.msk.f32.vlgmr.msra.gmra.mxu0 %vm234_vm0, %v225_v6  ;;  %689 = vmatmul.msk.f32.vlgmr.msra.gmra.mxu1 %vm234_vm0, %v225_v6 }
  0x11   : > { %v300_v9 = vand.u32 15, %v282_v4  ;;  %vm313_vm1 = vcmp.gt.s32.totalorder %v293_v5, 0  ;;  %vm317_vm2 = vcmp.lt.s32.totalorder %v293_v5, 15 }
  0x12   : > { %v315_v11 = vsel %vm313_vm1, 1.0, %v795_v10  ;;  %v319_v12 = vsel %vm317_vm2, 1.0, %v795_v10 }
  0x13   : > { %vm314_vm3 = vcmp.gt.s32.totalorder %v300_v9, 0  ;;  %vm318_vm4 = vcmp.lt.s32.totalorder %v300_v9, 15 }
  0x14   : > { %v316_v13 = vsel %vm314_vm3, 1.0, %v795_v10  ;;  %v320_v14 = vsel %vm318_vm4, 1.0, %v795_v10 }
  0x15   : > { %v720_v15 = vpack.i.bf16 %v316_v13, %v315_v11  ;;  %v715_v16 = vpack.i.bf16 %v320_v14, %v319_v12 }
  0x17   : > { %721 = vrot.lane.b32.xlu1 %v720_v15, %s796_s28  ;;  %716 = vrot.lane.b32.xlu0 %v715_v16, %s797_s29 }
  0x18   : > { %731 = vrot.lane.b32.xlu2 %v720_v15, %s798_s30 }
  0x1f   : > { %726 = vrot.lane.b32.xlu1 %v715_v16, %s799_s6  ;;  %741 = vrot.lane.b32.xlu0 %v720_v15, %s800_s7 }
  0x20   : > { %736 = vrot.lane.b32.xlu2 %v715_v16, %s801_s8 }
  0x27   : > { %509 = vrot.lane.b32.xlu1 %v795_v10, %s802_s9 }
  0x72   : > { %v869_v22 = vpop.permute.xlu2 %731 }
  0x73   : > { %v734_v33 = vunpack.i.h.bf16 %v869_v22  ;;  %v733_v34 = vunpack.i.l.bf16 %v869_v22 }
  0x75   : > { %v414_v43 = vsel %vm413_vm7, %v733_v34, %v734_v33  ;;  %v418_v50 = vmul.f32 0.0, %v733_v34 }
  0x7a   : > { %v737_v41 = vpop.permute.xlu2 %736 }
  0x7b   : > { %v739_v46 = vunpack.i.h.bf16 %v737_v41  ;;  %v738_v47 = vunpack.i.l.bf16 %v737_v41 }
  0x7d   : > { %v383_v54 = vsel %vm382_vm8, %v738_v47, %v739_v46  ;;  %v387_v58 = vmul.f32 0.0, %v738_v47 }
  0x7f   : > { %v232_v17 = vpop.permute.xlu0 %231 }
  0x89   : > { %v722_v18 = vpop.permute.xlu1 %721  ;;  %v717_v19 = vpop.permute.xlu0 %716 }
  0x8a   : > { %v724_v20 = vunpack.i.h.bf16 %v722_v18  ;;  %v719_v21 = vunpack.i.h.bf16 %v717_v19  ;;  %v723_v27 = vunpack.i.l.bf16 %v722_v18  ;;  %v718_v31 = vunpack.i.l.bf16 %v717_v19  ;;  %v566_v18 = vld [vmem:[%s954_s4] sm:$0xff] }
  0x8c   : > { %v483_v23 = vmul.f32 0.0, %v724_v20  ;;  %v531_v24 = vmul.f32 0.0, %v719_v21  ;;  %v477_v38 = vsel %vm399_vm5, %v723_v27, %v724_v20  ;;  %v525_v40 = vsel %vm347_vm6, %v718_v31, %v719_v21 }
  0x8d   : > { %v255_v25 = vpop.f32.mrf.mxu0  ;;  %v275_v26 = vpop.f32.mrf.mxu1 }
  0x8e   : > { %491 = vrot.lane.b32.xlu0 %v483_v23, %s801_s8  ;;  %539 = vrot.lane.b32.xlu2 %v531_v24, %s800_s7  ;;  %v256_v28 = vadd.f32 %v255_v25, %v232_v17  ;;  %v276_v29 = vadd.f32 %v275_v26, %v232_v17 }
  0x90   : > { %v875_v35 = vmax.f32 %v256_v28, 0.0  ;;  %v877_v36 = vmax.f32 %v276_v29, 0.0 }
  0x91   : > { %v727_v30 = vpop.permute.xlu1 %726  ;;  %v742_v59 = vpop.permute.xlu0 %741 }
  0x92   : > { %v729_v32 = vunpack.i.h.bf16 %v727_v30  ;;  %v750_v39 = vpack.i.bf16 %v875_v35, %v795_v10  ;;  %v745_v42 = vpack.i.bf16 %v877_v36, %v875_v35  ;;  %v481_v44 = vmul.f32 %v723_v27, %v875_v35 }
  0x93   : > { %v482_v45 = vmul.f32 %v477_v38, %v877_v36  ;;  %v529_v48 = vmul.f32 %v718_v31, %v875_v35  ;;  %v530_v49 = vmul.f32 %v525_v40, %v877_v36  ;;  %v728_v51 = vunpack.i.l.bf16 %v727_v30 }
  0x94   : > { %v454_v37 = vmul.f32 0.0, %v729_v32  ;;  %751 = vrot.lane.b32.xlu1 %v750_v39, %s803_s10  ;;  %v419_v52 = vmul.f32 %v414_v43, %v875_v35  ;;  %v388_v60 = vmul.f32 %v383_v54, %v875_v35  ;;  %v744_v63 = vunpack.i.h.bf16 %v742_v59 }
  0x95   : > { %v760_v53 = vpack.i.bf16 %v482_v45, %v481_v44  ;;  %v755_v55 = vpack.i.bf16 %v530_v49, %v529_v48  ;;  %v448_v56 = vsel %vm430_vm9, %v728_v51, %v729_v32  ;;  %v452_v61 = vmul.f32 %v728_v51, %v875_v35 }
  0x96   : > { %462 = vrot.lane.b32.xlu2 %v454_v37, %s798_s30  ;;  %746 = vrot.lane.b32.xlu0 %v745_v42, %s802_s9  ;;  %v770_v57 = vpack.i.bf16 %v419_v52, %v418_v50  ;;  %v453_v62 = vmul.f32 %v448_v56, %v877_v36  ;;  %v743_v0 = vunpack.i.l.bf16 %v742_v59  ;;  %v775_v1 = vpack.i.bf16 %v388_v60, %v387_v58 }
  0x97   : > { %v389_v3 = vmul.f32 %v739_v46, %v877_v36  ;;  %v420_v9 = vmul.f32 %v734_v33, %v877_v36  ;;  %v337_v11 = vmul.f32 %v744_v63, %v877_v36 }
  0x98   : > { %v765_v2 = vpack.i.bf16 %v453_v62, %v452_v61  ;;  %v331_v4 = vsel %vm330_vm10, %v743_v0, %v744_v63  ;;  %v335_v5 = vmul.f32 0.0, %v743_v0 }
  0x99   : > { %v336_v6 = vmul.f32 %v331_v4, %v875_v35  ;;  %v510_v13 = vpop.permute.xlu1 %509 }
  0x9b   : > { %v780_v10 = vpack.i.bf16 %v336_v6, %v335_v5 }
  0x9c   : > { %756 = vrot.lane.b32.xlu1 %v755_v55, %s800_s7 }
  0x9e   : > { %761 = vrot.lane.b32.xlu2 %v760_v53, %s801_s8  ;;  %771 = vrot.lane.b32.xlu0 %v770_v57, %s799_s6  ;;  %v547_v57 = vld [vmem:[%s953_s3] sm:$0xff] }
  0xa4   : > { %766 = vrot.lane.b32.xlu1 %v765_v2, %s798_s30 }
  0xa6   : > { %776 = vrot.lane.b32.xlu2 %v775_v1, %s796_s28  ;;  %397 = vrot.lane.b32.xlu0 %v389_v3, %s796_s28 }
  0xac   : > { %428 = vrot.lane.b32.xlu1 %v420_v9, %s799_s6 }
  0xae   : > { %364 = vrot.lane.b32.xlu2 %v877_v36, %s803_s10  ;;  %781 = vrot.lane.b32.xlu0 %v780_v10, %s797_s29 }
  0xb4   : > { %345 = vrot.lane.b32.xlu1 %v337_v11, %s797_s29 }
  0xb6   : > { %569 = vperm.xlu2 %785, %v566_v18  }
  0xe8   : > { %v540_v12 = vpop.permute.xlu2 %539 }
  0xf0   : > { %v463_v15 = vpop.permute.xlu2 %462 }
  0xf8   : > { %v762_v19 = vpop.permute.xlu2 %761 }
  0xf9   : > { %v764_v26 = vunpack.i.h.bf16 %v762_v19  ;;  %v763_v27 = vunpack.i.l.bf16 %v762_v19 }
  0xfb   : > { %v493_v32 = vsel %vm382_vm8, %v763_v27, %v764_v26 }
 0x100   : > { %v492_v14 = vpop.permute.xlu0 %491  ;;  %v777_v40 = vpop.permute.xlu2 %776 }
 0x101   : > { %v494_v33 = vsel %vm382_vm8, %v764_v26, %v492_v14  ;;  %v779_v45 = vunpack.i.h.bf16 %v777_v40  ;;  %v778_v46 = vunpack.i.l.bf16 %v777_v40 }
 0x103   : > { %v400_v52 = vsel %vm399_vm5, %v778_v46, %v779_v45 }
 0x106   : > { %v914_v16 = vpop.permute.xlu1 %751 }
 0x107   : > { %v754_v47 = vunpack.i.h.bf16 %v914_v16  ;;  %v753_v48 = vunpack.i.l.bf16 %v914_v16 }
 0x108   : > { %v747_v17 = vpop.permute.xlu0 %746  ;;  %v365_v56 = vpop.permute.xlu2 %364 }
 0x109   : > { %v749_v21 = vunpack.i.h.bf16 %v747_v17  ;;  %v748_v22 = vunpack.i.l.bf16 %v747_v17  ;;  %v368_v59 = vsel %vm366_vm12, %v754_v47, %v365_v56 }
 0x10b   : > { %v512_v30 = vsel %vm511_vm11, %v748_v22, %v749_v21  ;;  %v513_v31 = vsel %vm511_vm11, %v749_v21, %v510_v13 }
 0x10e   : > { %v757_v20 = vpop.permute.xlu1 %756 }
 0x10f   : > { %v759_v23 = vunpack.i.h.bf16 %v757_v20  ;;  %v758_v24 = vunpack.i.l.bf16 %v757_v20 }
 0x110   : > { %v772_v25 = vpop.permute.xlu0 %771  ;;  %v570_v62 = vpop.permute.xlu2 %569 }
 0x111   : > { %v541_v28 = vsel %vm330_vm10, %v758_v24, %v759_v23  ;;  %v542_v29 = vsel %vm330_vm10, %v759_v23, %v540_v12  ;;  %v774_v41 = vunpack.i.h.bf16 %v772_v25  ;;  %v773_v42 = vunpack.i.l.bf16 %v772_v25 }
 0x112   : > { %583 = vmatpush.msra.mxu2 %v541_v28  ;;  %603 = vmatpush.msra.mxu3 %v542_v29 }
 0x113   : > { %v431_v49 = vsel %vm430_vm9, %v773_v42, %v774_v41 }
 0x114   : > { %584 = vmatpush.msra.mxu2 %v512_v30  ;;  %604 = vmatpush.msra.mxu3 %v513_v31 }
 0x116   : > { %585 = vmatpush.msra.mxu2 %v493_v32  ;;  %605 = vmatpush.msra.mxu3 %v494_v33  ;;  %v767_v34 = vpop.permute.xlu1 %766 }
 0x117   : > { %v769_v37 = vunpack.i.h.bf16 %v767_v34  ;;  %v768_v38 = vunpack.i.l.bf16 %v767_v34 }
 0x118   : > { %v398_v39 = vpop.permute.xlu0 %397 }
 0x119   : > { %v464_v43 = vsel %vm413_vm7, %v768_v38, %v769_v37  ;;  %v465_v44 = vsel %vm413_vm7, %v769_v37, %v463_v15 }
 0x11a   : > { %586 = vmatpush.msra.mxu2 %v464_v43  ;;  %606 = vmatpush.msra.mxu3 %v465_v44 }
 0x11c   : > { %587 = vmatpush.msra.mxu2 %v875_v35  ;;  %607 = vmatpush.msra.mxu3 %v877_v36  ;;  %v367_v35 = vsel %vm366_vm12, %v753_v48, %v754_v47  ;;  %v401_v36 = vsel %vm399_vm5, %v779_v45, %v398_v39 }
 0x11e   : > { %v429_v50 = vpop.permute.xlu1 %428  ;;  %588 = vmatpush.msra.mxu2 %v431_v49 }
 0x11f   : > { %v432_v53 = vsel %vm430_vm9, %v774_v41, %v429_v50 }
 0x120   : > { %v782_v51 = vpop.permute.xlu0 %781  ;;  %589 = vmatpush.msra.mxu2 %v400_v52  ;;  %608 = vmatpush.msra.mxu3 %v432_v53 }
 0x121   : > { %v784_v54 = vunpack.i.h.bf16 %v782_v51  ;;  %v783_v55 = vunpack.i.l.bf16 %v782_v51 }
 0x122   : > { %590 = vmatpush.msra.mxu2 %v367_v35  ;;  %609 = vmatpush.msra.mxu3 %v401_v36 }
 0x123   : > { %v348_v58 = vsel %vm347_vm6, %v783_v55, %v784_v54 }
 0x124   : > { %591 = vmatpush.msra.mxu2 %v348_v58  ;;  %610 = vmatpush.msra.mxu3 %v368_v59 }
 0x125   : > { %690 = vmatmul.msk.f32.vlgmr.msra.gmra.mxu2 %vm572_vm13, %v547_v57 }
 0x126   : > { %v346_v60 = vpop.permute.xlu1 %345 }
 0x127   : > { %v349_v61 = vsel %vm347_vm6, %v784_v54, %v346_v60 }
 0x128   : > { %611 = vmatpush.msra.mxu3 %v349_v61 }
 0x129   : > { %691 = vmatmul.msk.f32.vlgmr.msra.gmra.mxu3 %vm572_vm13, %v547_v57 }
 0x1a8   : > { %v593_v63 = vpop.f32.mrf.mxu2 }
 0x1a9   : > { %v594_v0 = vadd.f32 %v593_v63, %v570_v62 }
 0x1ab   : > { %v618_v1 = vadd.f32 %v594_v0, %v856_v7 }
 0x1ac   : > { %v613_v2 = vpop.f32.mrf.mxu3 }
 0x1ad   : > { %v620_v3 = vmax.f32 %v618_v1, 0.0  ;;  %v614_v4 = vadd.f32 %v613_v2, %v570_v62 }
 0x1af   : > { %622 = vst [vmem:[%s224_s17] sm:$0xff] %v620_v3  ;;  %v619_v5 = vadd.f32 %v614_v4, %v858_v8 }
 0x1b1   : > { %v621_v6 = vmax.f32 %v619_v5, 0.0 }
 0x1b3   : > { %623 = vst [vmem:[%s224_s17 + $0x8] sm:$0xff] %v621_v6 }
 0x1b4 PF: > { %s15_s18 = sadd.s32 1, %s792_s18  }
 0x1b5   : > { %p12_p4 = scmp.ge.s32.totalorder %s15_s18, 4  }
 0x1b7   :  { %14 = sbr.rel (!%p12_p4) target bundleno = 1 (0x1), region = 70 }

</bundles_post_ra>
